<compile_context>
chip_gen: v7x
topology: tpu7x:2x2x1
jax: 0.10.0
libtpu: 0.0.40
codegen_flags: <defaults>
</compile_context>

<pallas_src>
import jax
import jax.numpy as jnp
from jax.experimental import pallas as pl
from jax.experimental.pallas import tpu as pltpu

INPUT_SIZE = 4
HIDE1 = 16
HIDE2 = 12
OUTPUT_SIZE = 3

DEFAULT_TB = 8192                      # batch-tile rows; multiple of 8
VMEM_LIMIT_BYTES = 48 * 1024 * 1024    # ~16 MiB used at TB=8192; fits v7x's 64 MiB


def _mlp_kernel(x_ref, w1_ref, b1_ref, w2_ref, b2_ref, w3_ref, b3_ref, o_ref):
    # All-f32 path: the kernel is DMA/overhead bound, so f32 MXU matmuls are
    # free in wall-clock and numerically tight (no bf16 casts).
    h1 = jnp.dot(x_ref[...], w1_ref[...], preferred_element_type=jnp.float32)
    h1 = jnp.maximum(h1 + b1_ref[...], 0.0)
    h2 = jnp.dot(h1, w2_ref[...], preferred_element_type=jnp.float32)
    h2 = jnp.maximum(h2 + b2_ref[...], 0.0)
    y = jnp.dot(h2, w3_ref[...], preferred_element_type=jnp.float32)
    o_ref[...] = (y + b3_ref[...]).astype(o_ref.dtype)


def _round_up(n, m):
    return pl.cdiv(n, m) * m


def _pick_tb(batch, tb_max):
    tb = min(tb_max, _round_up(max(batch, 1), 8))
    # v7x megacore: keep >= 2 grid steps for reasonably large batches so
    # dimension_semantics=("parallel",) can shard the batch across both TCs.
    if batch >= 2048 and pl.cdiv(batch, tb) < 2:
        tb = _round_up(pl.cdiv(batch, 2), 8)
    return tb


def ann_two_hid_forward(x, params, *, tb=DEFAULT_TB):
    """x: (B, 4) float32.  params: (in,out) weights and (1,out) biases (f32)."""
    batch = x.shape[0]
    tb = _pick_tb(batch, tb)
    grid = (pl.cdiv(batch, tb),)       # ragged tail handled by Pallas block masking

    resident = lambda i: (0, 0)        # weights/biases stay VMEM-resident across steps
    return pl.pallas_call(
        _mlp_kernel,
        out_shape=jax.ShapeDtypeStruct((batch, OUTPUT_SIZE), jnp.float32),
        grid=grid,
        in_specs=[
            pl.BlockSpec((tb, INPUT_SIZE), lambda i: (i, 0)),   # x: batch-tiled
            pl.BlockSpec((INPUT_SIZE, HIDE1), resident),        # w1
            pl.BlockSpec((1, HIDE1), resident),                 # b1
            pl.BlockSpec((HIDE1, HIDE2), resident),             # w2
            pl.BlockSpec((1, HIDE2), resident),                 # b2
            pl.BlockSpec((HIDE2, OUTPUT_SIZE), resident),       # w3 (3 cols, no padding)
            pl.BlockSpec((1, OUTPUT_SIZE), resident),           # b3
        ],
        out_specs=pl.BlockSpec((tb, OUTPUT_SIZE), lambda i: (i, 0)),
        compiler_params=pltpu.CompilerParams(
            dimension_semantics=("parallel",),
            vmem_limit_bytes=VMEM_LIMIT_BYTES),
    )(x, params["w1"], params["b1"], params["w2"], params["b2"],
      params["w3"], params["b3"])


def init_params(key):
    """PyTorch nn.Linear-style init (uniform +-1/sqrt(fan_in)); weights stored
    as (in_features, out_features) = W_pytorch.T, biases as (1, out_features)."""
    ks = jax.random.split(key, 6)

    def lin(kw, kb, fan_in, fan_out):
        bound = 1.0 / jnp.sqrt(fan_in)
        w = jax.random.uniform(kw, (fan_in, fan_out), jnp.float32, -bound, bound)
        b = jax.random.uniform(kb, (1, fan_out), jnp.float32, -bound, bound)
        return w, b

    w1, b1 = lin(ks[0], ks[1], INPUT_SIZE, HIDE1)
    w2, b2 = lin(ks[2], ks[3], HIDE1, HIDE2)
    w3, b3 = lin(ks[4], ks[5], HIDE2, OUTPUT_SIZE)
    return {"w1": w1, "b1": b1, "w2": w2, "b2": b2, "w3": w3, "b3": b3}


def reference_forward(x, params):
    dot = lambda a, b: jnp.dot(a, b, precision=jax.lax.Precision.HIGHEST)
    h1 = jnp.maximum(dot(x, params["w1"]) + params["b1"], 0.0)
    h2 = jnp.maximum(dot(h1, params["w2"]) + params["b2"], 0.0)
    return dot(h2, params["w3"]) + params["b3"]


if __name__ == "__main__":
    key = jax.random.PRNGKey(0)
    k_param, k_x1, k_x2 = jax.random.split(key, 3)
    params = init_params(k_param)

    # Small ragged batch: single grid step, partial block masked by Pallas.
    B1 = 10
    x1 = jax.random.normal(k_x1, (B1, INPUT_SIZE), jnp.float32)
    y1 = jax.block_until_ready(ann_two_hid_forward(x1, params))
    y1_ref = reference_forward(x1, params)
    assert y1.shape == (B1, OUTPUT_SIZE)
    assert jnp.allclose(y1, y1_ref, atol=1e-4, rtol=1e-4)   # f32 path -> tight tol

    # Larger ragged batch: >=2 grid steps (megacore-friendly), resident weights,
    # masked trailing partial block, no wrapper pad/slice.
    B2 = 2500
    x2 = jax.random.normal(k_x2, (B2, INPUT_SIZE), jnp.float32)
    y2 = jax.block_until_ready(ann_two_hid_forward(x2, params))
    y2_ref = reference_forward(x2, params)
    assert y2.shape == (B2, OUTPUT_SIZE)
    assert jnp.allclose(y2, y2_ref, atol=1e-4, rtol=1e-4)

    # Explicit small tile to exercise a longer multi-step grid on the same data.
    y3 = jax.block_until_ready(ann_two_hid_forward(x2, params, tb=512))
    assert jnp.allclose(y3, y2_ref, atol=1e-4, rtol=1e-4)

    print("KERNEL_OK")
</pallas_src>

<mosaic_0001>
module attributes {stable_mosaic.version = 11 : i64} {
  func.func @_mlp_kernel(%arg0: i32, %arg1: memref<16x4xf32, #tpu.memory_space<vmem>>, %arg2: memref<4x16xf32, #tpu.memory_space<vmem>>, %arg3: memref<1x16xf32, #tpu.memory_space<vmem>>, %arg4: memref<16x12xf32, #tpu.memory_space<vmem>>, %arg5: memref<1x12xf32, #tpu.memory_space<vmem>>, %arg6: memref<12x3xf32, #tpu.memory_space<vmem>>, %arg7: memref<1x3xf32, #tpu.memory_space<vmem>>, %arg8: memref<16x3xf32, #tpu.memory_space<vmem>>) attributes {dimension_semantics = [#tpu.dimension_semantics<parallel>], iteration_bounds = array<i64: 1>, scalar_prefetch = 0 : i64, scratch_operands = 0 : i64, tpu.core_type = #tpu.core_type<tc>, window_params = [{transform_indices = @transform_0, window_bounds = array<i64: 16, 4>}, {pipeline_mode = #tpu.pipeline_mode<synchronous>, transform_indices = @transform_1, window_bounds = array<i64: 4, 16>}, {pipeline_mode = #tpu.pipeline_mode<synchronous>, transform_indices = @transform_2, window_bounds = array<i64: 1, 16>}, {pipeline_mode = #tpu.pipeline_mode<synchronous>, transform_indices = @transform_3, window_bounds = array<i64: 16, 12>}, {pipeline_mode = #tpu.pipeline_mode<synchronous>, transform_indices = @transform_4, window_bounds = array<i64: 1, 12>}, {pipeline_mode = #tpu.pipeline_mode<synchronous>, transform_indices = @transform_5, window_bounds = array<i64: 12, 3>}, {pipeline_mode = #tpu.pipeline_mode<synchronous>, transform_indices = @transform_6, window_bounds = array<i64: 1, 3>}, {transform_indices = @transform_7, window_bounds = array<i64: 16, 3>}]} {
    %c0 = arith.constant 0 : index
    %c0_0 = arith.constant 0 : index
    %0 = vector.load %arg1[%c0, %c0_0] : memref<16x4xf32, #tpu.memory_space<vmem>>, vector<16x4xf32>
    %c0_1 = arith.constant 0 : index
    %c0_2 = arith.constant 0 : index
    %1 = vector.load %arg2[%c0_1, %c0_2] : memref<4x16xf32, #tpu.memory_space<vmem>>, vector<4x16xf32>
    %cst = arith.constant dense<0.000000e+00> : vector<16x16xf32>
    %2 = tpu.matmul %0, %1, %cst {dimension_numbers = #tpu.dot_dimension_numbers<[1], [0], [0], [1], [0, 0, 1, 1], [], []>} : vector<16x4xf32>, vector<4x16xf32>, vector<16x16xf32> -> vector<16x16xf32>
    %c0_3 = arith.constant 0 : index
    %c0_4 = arith.constant 0 : index
    %3 = vector.load %arg3[%c0_3, %c0_4] : memref<1x16xf32, #tpu.memory_space<vmem>>, vector<1x16xf32>
    %4 = vector.broadcast %3 : vector<1x16xf32> to vector<16x16xf32>
    %5 = arith.addf %2, %4 : vector<16x16xf32>
    %cst_5 = arith.constant 0.000000e+00 : f32
    %6 = vector.broadcast %cst_5 : f32 to vector<16x16xf32>
    %7 = arith.maximumf %5, %6 : vector<16x16xf32>
    %c0_6 = arith.constant 0 : index
    %c0_7 = arith.constant 0 : index
    %8 = vector.load %arg4[%c0_6, %c0_7] : memref<16x12xf32, #tpu.memory_space<vmem>>, vector<16x12xf32>
    %cst_8 = arith.constant dense<0.000000e+00> : vector<16x12xf32>
    %9 = tpu.matmul %7, %8, %cst_8 {dimension_numbers = #tpu.dot_dimension_numbers<[1], [0], [0], [1], [0, 0, 1, 1], [], []>} : vector<16x16xf32>, vector<16x12xf32>, vector<16x12xf32> -> vector<16x12xf32>
    %c0_9 = arith.constant 0 : index
    %c0_10 = arith.constant 0 : index
    %10 = vector.load %arg5[%c0_9, %c0_10] : memref<1x12xf32, #tpu.memory_space<vmem>>, vector<1x12xf32>
    %11 = vector.broadcast %10 : vector<1x12xf32> to vector<16x12xf32>
    %12 = arith.addf %9, %11 : vector<16x12xf32>
    %cst_11 = arith.constant 0.000000e+00 : f32
    %13 = vector.broadcast %cst_11 : f32 to vector<16x12xf32>
    %14 = arith.maximumf %12, %13 : vector<16x12xf32>
    %c0_12 = arith.constant 0 : index
    %c0_13 = arith.constant 0 : index
    %15 = vector.load %arg6[%c0_12, %c0_13] : memref<12x3xf32, #tpu.memory_space<vmem>>, vector<12x3xf32>
    %cst_14 = arith.constant dense<0.000000e+00> : vector<16x3xf32>
    %16 = tpu.matmul %14, %15, %cst_14 {dimension_numbers = #tpu.dot_dimension_numbers<[1], [0], [0], [1], [0, 0, 1, 1], [], []>} : vector<16x12xf32>, vector<12x3xf32>, vector<16x3xf32> -> vector<16x3xf32>
    %c0_15 = arith.constant 0 : index
    %c0_16 = arith.constant 0 : index
    %17 = vector.load %arg7[%c0_15, %c0_16] : memref<1x3xf32, #tpu.memory_space<vmem>>, vector<1x3xf32>
    %18 = vector.broadcast %17 : vector<1x3xf32> to vector<16x3xf32>
    %19 = arith.addf %16, %18 : vector<16x3xf32>
    %c0_17 = arith.constant 0 : index
    %c0_18 = arith.constant 0 : index
    %20 = vector.load %arg8[%c0_17, %c0_18] : memref<16x3xf32, #tpu.memory_space<vmem>>, vector<16x3xf32>
    tpu.vector_store %arg8[%c0_17, %c0_18], %19 {strides = array<i32>} : memref<16x3xf32, #tpu.memory_space<vmem>>, vector<16x3xf32>,
    return
  }
  func.func @transform_0(%arg0: i32) -> (i32, i32) {
    %c0_i32 = arith.constant 0 : i32
    %c0_i32_0 = arith.constant 0 : i32
    return %arg0, %c0_i32 : i32, i32
  }
  func.func @transform_1(%arg0: i32) -> (i32, i32) {
    %c0_i32 = arith.constant 0 : i32
    %c0_i32_0 = arith.constant 0 : i32
    %c0_i32_1 = arith.constant 0 : i32
    return %c0_i32, %c0_i32_0 : i32, i32
  }
  func.func @transform_2(%arg0: i32) -> (i32, i32) {
    %c0_i32 = arith.constant 0 : i32
    %c0_i32_0 = arith.constant 0 : i32
    %c0_i32_1 = arith.constant 0 : i32
    return %c0_i32, %c0_i32_0 : i32, i32
  }
  func.func @transform_3(%arg0: i32) -> (i32, i32) {
    %c0_i32 = arith.constant 0 : i32
    %c0_i32_0 = arith.constant 0 : i32
    %c0_i32_1 = arith.constant 0 : i32
    return %c0_i32, %c0_i32_0 : i32, i32
  }
  func.func @transform_4(%arg0: i32) -> (i32, i32) {
    %c0_i32 = arith.constant 0 : i32
    %c0_i32_0 = arith.constant 0 : i32
    %c0_i32_1 = arith.constant 0 : i32
    return %c0_i32, %c0_i32_0 : i32, i32
  }
  func.func @transform_5(%arg0: i32) -> (i32, i32) {
    %c0_i32 = arith.constant 0 : i32
    %c0_i32_0 = arith.constant 0 : i32
    %c0_i32_1 = arith.constant 0 : i32
    return %c0_i32, %c0_i32_0 : i32, i32
  }
  func.func @transform_6(%arg0: i32) -> (i32, i32) {
    %c0_i32 = arith.constant 0 : i32
    %c0_i32_0 = arith.constant 0 : i32
    %c0_i32_1 = arith.constant 0 : i32
    return %c0_i32, %c0_i32_0 : i32, i32
  }
  func.func @transform_7(%arg0: i32) -> (i32, i32) {
    %c0_i32 = arith.constant 0 : i32
    %c0_i32_0 = arith.constant 0 : i32
    return %arg0, %c0_i32 : i32, i32
  }
}

</mosaic_0001>

<bundles_post_ra>
// kernel: tpu_custom_call.1
= control target key start
LH: loop header
LB: loop body
LE: loop exit
PB: predicated region body
PF: predicated region fallthrough
CT: control target
= control target key end

     0   :  { %vm43_vm0 = vcmask 1043456   ;;  %vm36_vm1 = vcmask 31744   ;;  %vm133_vm2 = vcmask 130048   ;;  %vm370_vm3 = vmmov 1   ;;  %s450_s1 = inlined_call_operand.vmem [shape: f32[4,16], index: 1, kind: input, shape index: {}]   ;;  %s451_s0 = inlined_call_operand.vmem [shape: f32[10,4], index: 0, kind: input, shape index: {}]   ;;  %s452_s3 = inlined_call_operand.vmem [shape: f32[16,12], index: 3, kind: input, shape index: {}]   ;;  %s453_s2 = inlined_call_operand.vmem [shape: f32[1,16], index: 2, kind: input, shape index: {}]   ;;  %s454_s5 = inlined_call_operand.vmem [shape: f32[12,3], index: 5, kind: input, shape index: {}]   ;;  %s455_s4 = inlined_call_operand.vmem [shape: f32[1,12], index: 4, kind: input, shape index: {}]   ;;  %s456_s6 = inlined_call_operand.vmem [shape: f32[1,3], index: 6, kind: input, shape index: {}]   ;;  %s457_s7 = inlined_call_operand.vmem [shape: f32[10,3], index: 7, kind: output, shape index: {}]  }
   0x1   :  { %v28_v0 = vld [vmem:[%s450_s1] sm:$0xf]  ;;  %v27_v2 = vld [vmem:[%s451_s0 + $0x8] sm:$0xff]  ;;  %vm364_vm4 = vmpackc.low %vm43_vm0, %vm370_vm3  ;;  %vm226_vm5 = vcmask 97280   ;;  %vm311_vm6 = vcmask 23552  }
   0x2   :  { %v26_v1 = vld [vmem:[%s451_s0] sm:$0xff]  ;;  %340 = vmatprep.subr.msk.mxu0 %vm43_vm0, %v28_v0  ;;  %v125_v4 = vld [vmem:[%s452_s3 + $0x8] sm:$0xff] }
   0x3   :  { %342 = vmatprep.mubr.msk.f32.mxu0 %vm36_vm1, %v26_v1  ;;  %341 = vmatpush3.msk.msra.mxu0 %vm43_vm0, %v28_v0  ;;  %v124_v3 = vld [vmem:[%s452_s3] sm:$0xff]  ;;  %v218_v14 = vld [vmem:[%s454_s5 + $0x8] sm:$0xf] }
   0x4   :  { %343 = vmatmul.mubr.msk.f32.vlgmr.msra.gmra.mrb[0].mxu0 %vm36_vm1, %v27_v2  ;;  %v359_v5 = vpack.c.bf16 %v125_v4, %v124_v3  ;;  %v318_v6 = vld [vmem:[%s453_s2] ss:$0 sm:$0xff] }
   0x5   :  { %v217_v13 = vld [vmem:[%s454_s5] sm:$0xff] }
   0x6   :  { %360 = vmatprep.subr.bf16.mxu1 %v359_v5  ;;  %v363_v15 = vpack.c.bf16 %v218_v14, %v217_v13  ;;  %v322_v16 = vld [vmem:[%s455_s4] ss:$0 sm:$0xff] }
   0x7   :  { %362 = vmatpush3.bf16.msra.mxu1 %v359_v5  ;;  %v325_v23 = vld [vmem:[%s456_s6] ss:$0 sm:$0xff] }
   0x8   :  { %365 = vmatprep.subr.msk.bf16.mxu0 %vm364_vm4, %v363_v15 }
   0x9   :  { %368 = vmatpush3.bf16.msk.msra.mxu0 %vm364_vm4, %v363_v15 }
  0xd7   :  { %v344_v7 = vpop.f32.mrb[0].mxu0 }
  0xd8   :  { %v119_v8 = vadd.f32 %v344_v7, %v318_v6  ;;  %v113_v9 = vpop.f32.mrb[1].mxu0 }
  0xd9   :  { %v114_v10 = vadd.f32 %v318_v6, %v113_v9 }
  0xda   :  { %v123_v12 = vmax.f32 %v119_v8, 0.0 }
  0xdb   :  { %v122_v11 = vmax.f32 %v114_v10, 0.0 }
  0xdd   :  { %349 = vmatprep.mubr.msk.f32.mxu1 %vm133_vm2, %v122_v11 }
  0xde   :  { %350 = vmatmul.mubr.msk.f32.vlgmr.msra.gmra.mrb[0].mxu1 %vm133_vm2, %v123_v12 }
 0x1b1   :  { %v351_v17 = vpop.f32.mrb[0].mxu1 }
 0x1b2   :  { %v212_v18 = vadd.f32 %v351_v17, %v322_v16  ;;  %v206_v19 = vpop.f32.mrb[1].mxu1 }
 0x1b3   :  { %v207_v20 = vadd.f32 %v322_v16, %v206_v19 }
 0x1b4   :  { %v216_v22 = vmax.f32 %v212_v18, 0.0 }
 0x1b5   :  { %v215_v21 = vmax.f32 %v207_v20, 0.0 }
 0x1b7   :  { %356 = vmatprep.mubr.msk.f32.mxu0 %vm226_vm5, %v215_v21 }
 0x1b8   :  { %357 = vmatmul.mubr.msk.f32.vlgmr.msra.gmra.mrb[2].mxu0 %vm226_vm5, %v216_v22 }
 0x28b   :  { %v358_v24 = vpop.f32.mrb[2].mxu0 }
 0x28c   :  { %v308_v25 = vadd.f32 %v358_v24, %v325_v23  ;;  %v302_v26 = vpop.f32.mrb[3].mxu0 }
 0x28d   :  { %v303_v27 = vadd.f32 %v325_v23, %v302_v26 }
 0x28e   :  { %313 = vst.msk [vmem:[%s457_s7 + $0x8] sm:$0xff] %vm311_vm6, %v308_v25 }
 0x28f   :  { %312 = vst.msk [vmem:[%s457_s7] sm:$0xff] %vm311_vm6, %v303_v27 }

</bundles_post_ra>
